<compile_context>
chip_gen: v6e
topology: v6e:2x2x1
jax: 0.10.0
libtpu: 0.0.40
codegen_flags: <defaults>
</compile_context>

<pallas_src>
import functools

import jax
import jax.numpy as jnp
from jax.experimental import pallas as pl
from jax.experimental.pallas import tpu as pltpu


_LANE = 128
# Per-block byte budget.  Double-buffered input + output blocks at this size
# keep the pipeline around ~8 MiB of VMEM -> safe on v5e/v6e/v7x defaults.
_TARGET_BLOCK_BYTES = 2 * 1024 * 1024


def _pgn_affine_kernel(x_ref, w_ref, b_ref, o_ref, *, inv_cg):
    # x_ref/o_ref: (bR, Cg, tHW)   w_ref/b_ref: (1, tHW)
    x = x_ref[...].astype(jnp.float32)
    mean = jnp.sum(x, axis=1, keepdims=True) * inv_cg   # per-position group mean
    centered = x - mean
    w = w_ref[...].astype(jnp.float32)[:, None, :]       # (1, 1, tHW)
    b = b_ref[...].astype(jnp.float32)[:, None, :]
    o_ref[...] = (centered * w + b).astype(o_ref.dtype)


def _pgn_kernel(x_ref, o_ref, *, inv_cg):
    # x_ref/o_ref: (bR, Cg, tHW)
    x = x_ref[...].astype(jnp.float32)
    mean = jnp.sum(x, axis=1, keepdims=True) * inv_cg
    o_ref[...] = (x - mean).astype(o_ref.dtype)


def _largest_divisor_at_most(n, cap):
    cap = max(1, min(n, cap))
    for d in range(cap, 0, -1):
        if n % d == 0:
            return d
    return 1


def pointwise_group_norm_centering(x, weight=None, bias=None, *, num_groups,
                                   affine=True):
    """x: (N, C, H, W) NCHW.  weight/bias: (C,) (affine broadcasts along W)."""
    N, C, H, W = x.shape
    if C % num_groups != 0:
        raise ValueError("num_channels must be divisible by num_groups")
    G = num_groups
    Cg = C // G
    HW = H * W
    rows = N * G
    itemsize = jnp.dtype(x.dtype).itemsize

    # ---- tile selection: lane-dense (multiple of 128), ~2 MiB blocks ----
    max_thw = max(_LANE,
                  (_TARGET_BLOCK_BYTES // max(1, Cg * itemsize)) // _LANE * _LANE)
    if HW < _LANE:
        # Tiny spatial extent: block covers the full (array-dim-equal) lane axis.
        tHW = HW
    else:
        # Multiple of 128, never wider than HW; ragged tail becomes a partial
        # edge block handled by Pallas (masked stores), no wrapper padding.
        tHW = min((HW // _LANE) * _LANE, max_thw)
    n_hw = pl.cdiv(HW, tHW)

    want_rows = max(1, _TARGET_BLOCK_BYTES // max(1, Cg * tHW * itemsize))
    bR = _largest_divisor_at_most(rows, want_rows)   # batch of (n, g) rows/block

    # HW tiles outer, row tiles inner -> weight/bias block index constant across
    # the inner loop (constant blocks are not re-fetched every step).
    grid = (n_hw, rows // bR)

    x_r = x.reshape(rows, Cg, HW)                    # free view, no copy

    x_spec = pl.BlockSpec((bR, Cg, tHW), lambda s, r: (r, 0, s))
    out_spec = pl.BlockSpec((bR, Cg, tHW), lambda s, r: (r, 0, s))
    out_shape = jax.ShapeDtypeStruct((rows, Cg, HW), x.dtype)
    cparams = pltpu.CompilerParams(
        dimension_semantics=("parallel", "parallel"))
    inv_cg = 1.0 / Cg

    if affine:
        # PyTorch quirk: (C,) broadcasts against the LAST (W) axis of NCHW;
        # result[n, c, h, w] = centered[n, c, h, w] * weight[w] + bias[w].
        w_hw = jnp.broadcast_to(weight.astype(jnp.float32), (H, W)).reshape(1, HW)
        b_hw = jnp.broadcast_to(bias.astype(jnp.float32), (H, W)).reshape(1, HW)
        wb_spec = pl.BlockSpec((1, tHW), lambda s, r: (0, s))
        out = pl.pallas_call(
            functools.partial(_pgn_affine_kernel, inv_cg=inv_cg),
            out_shape=out_shape,
            grid_spec=pltpu.PrefetchScalarGridSpec(
                num_scalar_prefetch=0,
                grid=grid,
                in_specs=[x_spec, wb_spec, wb_spec],
                out_specs=out_spec,
            ),
            compiler_params=cparams,
        )(x_r, w_hw, b_hw)
    else:
        out = pl.pallas_call(
            functools.partial(_pgn_kernel, inv_cg=inv_cg),
            out_shape=out_shape,
            grid_spec=pltpu.PrefetchScalarGridSpec(
                num_scalar_prefetch=0,
                grid=grid,
                in_specs=[x_spec],
                out_specs=out_spec,
            ),
            compiler_params=cparams,
        )(x_r)

    return out.reshape(N, C, H, W)


def _reference(x, weight, bias, num_groups, affine=True):
    """Plain-JAX transcription of the PyTorch forward (for verification)."""
    N, C, H, W = x.shape
    xg = x.reshape(N, num_groups, C // num_groups, H, W)
    mean = jnp.mean(xg, axis=2, keepdims=True)
    out = (xg - mean).reshape(N, C, H, W)
    if affine:
        out = out * weight + bias  # (C,) broadcasts over last (W) dim, like torch
    return out


if __name__ == "__main__":
    # --- affine=True: W == C so the module's affine broadcast is well-defined ---
    N, C, H, W, G = 2, 16, 8, 16, 4
    x = jax.random.normal(jax.random.PRNGKey(0), (N, C, H, W), dtype=jnp.float32)
    # reset_parameters(): weight = ones, bias = zeros (deterministic init).
    weight = jnp.ones((C,), jnp.float32)
    bias = jnp.zeros((C,), jnp.float32)

    out = pointwise_group_norm_centering(x, weight, bias, num_groups=G, affine=True)
    out = jax.block_until_ready(out)
    ref = _reference(x, weight, bias, G, affine=True)
    assert out.shape == (N, C, H, W) and out.dtype == x.dtype
    assert jnp.allclose(out, ref, atol=1e-5, rtol=1e-5), "affine mismatch"

    # --- affine=True with ragged HW (exercises partial lane block, W == C) ---
    N2, C2, H2, W2, G2 = 2, 8, 20, 8, 2
    x2 = jax.random.normal(jax.random.PRNGKey(1), (N2, C2, H2, W2), jnp.float32)
    w2 = jax.random.normal(jax.random.PRNGKey(2), (C2,), jnp.float32)
    b2 = jax.random.normal(jax.random.PRNGKey(3), (C2,), jnp.float32)
    out2 = jax.block_until_ready(
        pointwise_group_norm_centering(x2, w2, b2, num_groups=G2, affine=True))
    assert jnp.allclose(out2, _reference(x2, w2, b2, G2, True),
                        atol=1e-5, rtol=1e-5), "ragged affine mismatch"

    # --- affine=False path (x-only kernel, small HW < 128) ---
    N3, C3, H3, W3, G3 = 2, 6, 5, 7, 3
    x3 = jax.random.normal(jax.random.PRNGKey(4), (N3, C3, H3, W3), jnp.float32)
    out3 = jax.block_until_ready(
        pointwise_group_norm_centering(x3, num_groups=G3, affine=False))
    assert jnp.allclose(out3, _reference(x3, None, None, G3, False),
                        atol=1e-5, rtol=1e-5), "non-affine mismatch"

    print("KERNEL_OK")
</pallas_src>

<mosaic_0001>
module attributes {stable_mosaic.version = 11 : i64} {
  func.func @_pgn_affine_kernel(%arg0: i32, %arg1: i32, %arg2: memref<8x4x128xf32, #tpu.memory_space<vmem>>, %arg3: memref<1x128xf32, #tpu.memory_space<vmem>>, %arg4: memref<1x128xf32, #tpu.memory_space<vmem>>, %arg5: memref<8x4x128xf32, #tpu.memory_space<vmem>>) attributes {dimension_semantics = [#tpu.dimension_semantics<parallel>, #tpu.dimension_semantics<parallel>], iteration_bounds = array<i64: 1, 1>, scalar_prefetch = 0 : i64, scratch_operands = 0 : i64, tpu.core_type = #tpu.core_type<tc>, window_params = [{transform_indices = @transform_0, window_bounds = array<i64: 8, 4, 128>}, {transform_indices = @transform_1, window_bounds = array<i64: 1, 128>}, {transform_indices = @transform_2, window_bounds = array<i64: 1, 128>}, {transform_indices = @transform_3, window_bounds = array<i64: 8, 4, 128>}]} {
    %c0 = arith.constant 0 : index
    %c0_0 = arith.constant 0 : index
    %c0_1 = arith.constant 0 : index
    %0 = vector.load %arg2[%c0, %c0_0, %c0_1] : memref<8x4x128xf32, #tpu.memory_space<vmem>>, vector<8x4x128xf32>
    %cst = arith.constant dense<0.000000e+00> : vector<8x128xf32>
    %1 = vector.multi_reduction <add>, %0, %cst [1] : vector<8x4x128xf32> to vector<8x128xf32>
    %2 = vector.shape_cast %1 : vector<8x128xf32> to vector<8x1x128xf32>
    %cst_2 = arith.constant 2.500000e-01 : f32
    %3 = vector.broadcast %cst_2 : f32 to vector<8x1x128xf32>
    %4 = arith.mulf %2, %3 : vector<8x1x128xf32>
    %5 = vector.broadcast %4 : vector<8x1x128xf32> to vector<8x4x128xf32>
    %6 = arith.subf %0, %5 : vector<8x4x128xf32>
    %c0_3 = arith.constant 0 : index
    %c0_4 = arith.constant 0 : index
    %7 = vector.load %arg3[%c0_3, %c0_4] : memref<1x128xf32, #tpu.memory_space<vmem>>, vector<1x128xf32>
    %8 = vector.shape_cast %7 : vector<1x128xf32> to vector<1x1x128xf32>
    %c0_5 = arith.constant 0 : index
    %c0_6 = arith.constant 0 : index
    %9 = vector.load %arg4[%c0_5, %c0_6] : memref<1x128xf32, #tpu.memory_space<vmem>>, vector<1x128xf32>
    %10 = vector.shape_cast %9 : vector<1x128xf32> to vector<1x1x128xf32>
    %11 = vector.broadcast %8 : vector<1x1x128xf32> to vector<8x4x128xf32>
    %12 = arith.mulf %6, %11 : vector<8x4x128xf32>
    %13 = vector.broadcast %10 : vector<1x1x128xf32> to vector<8x4x128xf32>
    %14 = arith.addf %12, %13 : vector<8x4x128xf32>
    %c0_7 = arith.constant 0 : index
    %c0_8 = arith.constant 0 : index
    %c0_9 = arith.constant 0 : index
    %15 = vector.load %arg5[%c0_7, %c0_8, %c0_9] : memref<8x4x128xf32, #tpu.memory_space<vmem>>, vector<8x4x128xf32>
    tpu.vector_store %arg5[%c0_7, %c0_8, %c0_9], %14 {strides = array<i32>} : memref<8x4x128xf32, #tpu.memory_space<vmem>>, vector<8x4x128xf32>,
    return
  }
  func.func @transform_0(%arg0: i32, %arg1: i32) -> (i32, i32, i32) {
    %c0_i32 = arith.constant 0 : i32
    %c0_i32_0 = arith.constant 0 : i32
    return %arg1, %c0_i32, %arg0 : i32, i32, i32
  }
  func.func @transform_1(%arg0: i32, %arg1: i32) -> (i32, i32) {
    %c0_i32 = arith.constant 0 : i32
    %c0_i32_0 = arith.constant 0 : i32
    return %c0_i32, %arg0 : i32, i32
  }
  func.func @transform_2(%arg0: i32, %arg1: i32) -> (i32, i32) {
    %c0_i32 = arith.constant 0 : i32
    %c0_i32_0 = arith.constant 0 : i32
    return %c0_i32, %arg0 : i32, i32
  }
  func.func @transform_3(%arg0: i32, %arg1: i32) -> (i32, i32, i32) {
    %c0_i32 = arith.constant 0 : i32
    %c0_i32_0 = arith.constant 0 : i32
    return %arg1, %c0_i32, %arg0 : i32, i32, i32
  }
}

</mosaic_0001>

<bundles_post_ra>
// kernel: tpu_custom_call.1
= control target key start
LH: loop header
LB: loop body
LE: loop exit
PB: predicated region body
PF: predicated region fallthrough
CT: control target
= control target key end

     0   :  { %8 = vsyncpa [#allocation3], 0  ;;  %s297_s0 = inlined_call_operand.hbm [shape: f32[8,4,128], index: 0, kind: input, shape index: {}]   ;;  %s298_s1 = inlined_call_operand.vmem [shape: f32[1,128], index: 1, kind: input, shape index: {}]   ;;  %s299_s2 = inlined_call_operand.vmem [shape: f32[1,128], index: 2, kind: input, shape index: {}]   ;;  %s300_s3 = inlined_call_operand.hbm [shape: f32[8,4,128], index: 3, kind: output, shape index: {}]  }
   0x1   :  { %9 = vsyncpa [#allocation4], 0  ;;  %s215_s12 = smov [#allocation2]  }
   0x2   :  { %s15_s13 = sshll.u32 %s215_s12, 4  ;;  %s16_s13 = int_to_ptr.vmem [resolvable:$true] %s15_s13 }
   0x3   :  { %s179_s14 = scalar_lea.vmem %s16_s13, 512  ;;  %p184_p1 = scmp.lt.s32.totalorder %s16_s13, %s16_s13 }
   0x4   :  { %p180_p0 = scmp.ne.s32.totalorder %s16_s13, %s179_s14  ;;  %p185_p2 = scmp.lt.s32.totalorder %s179_s14, %s179_s14 }
   0x6   :  { %p186_p3 = por %p185_p2, %p184_p1 }
   0x8   :  { %p187_p4 = pnand %p186_p3, %p180_p0 }
   0xa   :  { %190 = shalt.err (!%p187_p4)
}
   0xb   :  { %s216_s15 = smov 64   ;;  %s217_s16 = smov 4  }
   0xc   :  { %21 = dma.hbm_to_vmem [thread:$0]  %s297_s0, 512, %s16_s13, [#allocation3], %s216_s15, %s216_s15, %s217_s16  }
   0xd   :  { %211 = dma.done.wait [#allocation3], 512  }
   0xe   :  { %212 = vsyncadd [#allocation3], 4294966784  ;;  %vm37_vm0 = vcmask 1043456   ;;  %v245_v0 = vld [vmem:[#allocation2] sm:$0xf] }
   0xf   :  { %v38_v1 = vsel %vm37_vm0, %v245_v0, 0.0  ;;  %v249_v2 = vld [vmem:[#allocation2 + $0x4] sm:$0xf]  ;;  %v251_v3 = vld [vmem:[#allocation2 + $0x8] sm:$0xf] }
  0x10   :  { %v39_v4 = vrot.slane %v38_v1, 4  ;;  %v45_v5 = vsel %vm37_vm0, %v249_v2, 0.0  ;;  %v52_v6 = vsel %vm37_vm0, %v251_v3, 0.0  ;;  %v257_v7 = vld [vmem:[#allocation2 + $0xc] sm:$0xf] }
  0x11   :  { %v46_v8 = vrot.slane %v45_v5, 4  ;;  %v53_v9 = vrot.slane %v52_v6, 4  ;;  %v59_v10 = vsel %vm37_vm0, %v257_v7, 0.0  ;;  %v261_v11 = vld [vmem:[#allocation2 + $0x10] sm:$0xf] }
  0x12   :  { %v40_v12 = vadd.f32 %v39_v4, %v38_v1  ;;  %v60_v13 = vrot.slane %v59_v10, 4  ;;  %v66_v14 = vsel %vm37_vm0, %v261_v11, 0.0  ;;  %v265_v15 = vld [vmem:[#allocation2 + $0x14] sm:$0xf]  ;;  %v267_v16 = vld [vmem:[#allocation2 + $0x18] sm:$0xf] }
  0x13   :  { %v47_v17 = vadd.f32 %v46_v8, %v45_v5  ;;  %v54_v18 = vadd.f32 %v53_v9, %v52_v6  ;;  %v67_v19 = vrot.slane %v66_v14, 4  ;;  %v73_v20 = vsel %vm37_vm0, %v265_v15, 0.0  ;;  %v271_v21 = vld [vmem:[#allocation2 + $0x1c] sm:$0xf]  ;;  %v165_v58 = vld [vmem:[%s298_s1] ss:$0 sm:$0xff] }
  0x14   :  { %v41_v22 = vrot.slane %v40_v12, 2  ;;  %v61_v23 = vadd.f32 %v60_v13, %v59_v10  ;;  %v74_v24 = vrot.slane %v73_v20, 4  ;;  %v80_v25 = vsel %vm37_vm0, %v267_v16, 0.0  ;;  %v166_v6 = vld [vmem:[%s299_s2] ss:$0 sm:$0xff]  ;;  %s218_s1 = smov [#allocation5]  }
  0x15   :  { %v48_v26 = vrot.slane %v47_v17, 2  ;;  %v55_v27 = vrot.slane %v54_v18, 2  ;;  %v68_v28 = vadd.f32 %v67_v19, %v66_v14  ;;  %v81_v29 = vrot.slane %v80_v25, 4  ;;  %s153_s2 = sshll.u32 %s218_s1, 4  ;;  %s154_s2 = int_to_ptr.vmem [resolvable:$true] %s153_s2 }
  0x16   :  { %v42_v30 = vadd.f32 %v41_v22, %v40_v12  ;;  %v62_v31 = vrot.slane %v61_v23, 2  ;;  %v75_v32 = vadd.f32 %v74_v24, %v73_v20  ;;  %v87_v33 = vsel %vm37_vm0, %v271_v21, 0.0  ;;  %s191_s22 = scalar_lea.vmem %s154_s2, 512  ;;  %p196_p6 = scmp.lt.s32.totalorder %s154_s2, %s154_s2 }
  0x17   :  { %v49_v34 = vadd.f32 %v48_v26, %v47_v17  ;;  %v56_v35 = vadd.f32 %v55_v27, %v54_v18  ;;  %v69_v36 = vrot.slane %v68_v28, 2  ;;  %v82_v37 = vadd.f32 %v81_v29, %v80_v25  ;;  %p192_p5 = scmp.ne.s32.totalorder %s154_s2, %s191_s22  ;;  %p197_p7 = scmp.lt.s32.totalorder %s191_s22, %s191_s22 }
  0x18   :  { %v43_v38 = vrot.slane %v42_v30, 1  ;;  %v63_v39 = vadd.f32 %v62_v31, %v61_v23  ;;  %v76_v40 = vrot.slane %v75_v32, 2  ;;  %v88_v41 = vrot.slane %v87_v33, 4 }
  0x19   :  { %v50_v42 = vrot.slane %v49_v34, 1  ;;  %v57_v43 = vrot.slane %v56_v35, 1  ;;  %v70_v44 = vadd.f32 %v69_v36, %v68_v28  ;;  %v83_v45 = vrot.slane %v82_v37, 2  ;;  %p198_p8 = por %p197_p7, %p196_p6 }
  0x1a   :  { %v44_v46 = vadd.f32 %v43_v38, %v42_v30  ;;  %v64_v47 = vrot.slane %v63_v39, 1  ;;  %v77_v48 = vadd.f32 %v76_v40, %v75_v32  ;;  %v89_v49 = vadd.f32 %v88_v41, %v87_v33 }
  0x1b   :  { %v51_v50 = vadd.f32 %v50_v42, %v49_v34  ;;  %v58_v51 = vadd.f32 %v57_v43, %v56_v35  ;;  %v71_v52 = vrot.slane %v70_v44, 1  ;;  %v84_v53 = vadd.f32 %v83_v45, %v82_v37  ;;  %p199_p9 = pnand %p198_p8, %p192_p5 }
  0x1c   :  { %v94_v54 = vmul.f32 0.25, %v44_v46  ;;  %v65_v55 = vadd.f32 %v64_v47, %v63_v39  ;;  %v78_v56 = vrot.slane %v77_v48, 1  ;;  %v90_v57 = vrot.slane %v89_v49, 2 }
  0x1d   :  { %v95_v59 = vmul.f32 0.25, %v51_v50  ;;  %v96_v60 = vmul.f32 0.25, %v58_v51  ;;  %v72_v61 = vadd.f32 %v71_v52, %v70_v44  ;;  %v85_v62 = vrot.slane %v84_v53, 1 }
  0x1e   :  { %v102_v63 = vsub.f32 %v245_v0, %v94_v54  ;;  %v97_v1 = vmul.f32 0.25, %v65_v55  ;;  %v79_v4 = vadd.f32 %v78_v56, %v77_v48  ;;  %v91_v5 = vadd.f32 %v90_v57, %v89_v49 }
  0x1f   :  { %v103_v8 = vsub.f32 %v249_v2, %v95_v59  ;;  %v104_v9 = vsub.f32 %v251_v3, %v96_v60  ;;  %v98_v10 = vmul.f32 0.25, %v72_v61  ;;  %v86_v12 = vadd.f32 %v85_v62, %v84_v53 }
  0x20   :  { %v118_v13 = vmul.f32 %v165_v58, %v102_v63  ;;  %v105_v14 = vsub.f32 %v257_v7, %v97_v1  ;;  %v99_v17 = vmul.f32 0.25, %v79_v4  ;;  %v92_v18 = vrot.slane %v91_v5, 1 }
  0x21   :  { %v119_v19 = vmul.f32 %v165_v58, %v103_v8  ;;  %v120_v0 = vmul.f32 %v165_v58, %v104_v9  ;;  %v106_v20 = vsub.f32 %v261_v11, %v98_v10  ;;  %v100_v22 = vmul.f32 0.25, %v86_v12 }
  0x22   :  { %v132_v23 = vadd.f32 %v166_v6, %v118_v13  ;;  %v121_v24 = vmul.f32 %v165_v58, %v105_v14  ;;  %v107_v25 = vsub.f32 %v265_v15, %v99_v17  ;;  %v93_v26 = vadd.f32 %v92_v18, %v91_v5 }
  0x23   :  { %v133_v2 = vadd.f32 %v166_v6, %v119_v19  ;;  %v134_v27 = vadd.f32 %v166_v6, %v120_v0  ;;  %v122_v3 = vmul.f32 %v165_v58, %v106_v20  ;;  %v108_v28 = vsub.f32 %v267_v16, %v100_v22 }
  0x24   :  { %140 = vst [vmem:[#allocation5] sm:$0xf] %v132_v23  ;;  %v135_v29 = vadd.f32 %v166_v6, %v121_v24  ;;  %v123_v7 = vmul.f32 %v165_v58, %v107_v25  ;;  %v101_v30 = vmul.f32 0.25, %v93_v26 }
  0x25   :  { %141 = vst [vmem:[#allocation5 + $0x4] sm:$0xf] %v133_v2  ;;  %142 = vst [vmem:[#allocation5 + $0x8] sm:$0xf] %v134_v27  ;;  %v136_v31 = vadd.f32 %v166_v6, %v122_v3  ;;  %v124_v32 = vmul.f32 %v165_v58, %v108_v28 }
  0x26   :  { %143 = vst [vmem:[#allocation5 + $0xc] sm:$0xf] %v135_v29  ;;  %v137_v11 = vadd.f32 %v166_v6, %v123_v7  ;;  %v109_v33 = vsub.f32 %v271_v21, %v101_v30 }
  0x27   :  { %144 = vst [vmem:[#allocation5 + $0x10] sm:$0xf] %v136_v31  ;;  %v138_v15 = vadd.f32 %v166_v6, %v124_v32 }
  0x28   :  { %145 = vst [vmem:[#allocation5 + $0x14] sm:$0xf] %v137_v11  ;;  %v125_v34 = vmul.f32 %v165_v58, %v109_v33 }
  0x29   :  { %146 = vst [vmem:[#allocation5 + $0x18] sm:$0xf] %v138_v15 }
  0x2a   :  { %v139_v16 = vadd.f32 %v166_v6, %v125_v34 }
  0x2c   :  { %147 = vst [vmem:[#allocation5 + $0x1c] sm:$0xf] %v139_v16 }
  0x2d   :  { %202 = shalt.err (!%p199_p9)
}
  0x2e   :  { %159 = dma.vmem_to_hbm [thread:$0]  %s154_s2, 512, %s300_s3, [#allocation4], %s216_s15, %s216_s15, %s217_s16  }
  0x2f   :  { %213 = dma.done.wait [#allocation4], 512  }
  0x30   :  { %214 = vsyncadd [#allocation4], 4294966784 }
  0x31   :  { %163 = vsyncpa [#allocation3], 1 }
  0x32   :  { %164 = vsyncpa [#allocation4], 1 }

</bundles_post_ra>
